<compile_context>
chip_gen: v7x
topology: tpu7x:2x2x1
jax: 0.10.0
libtpu: 0.0.40
codegen_flags: <defaults>
</compile_context>

<pallas_src>
import functools

import jax
import jax.numpy as jnp
import numpy as np
from jax.experimental import pallas as pl
from jax.experimental.pallas import tpu as pltpu


def _round_up(n, m):
    return ((n + m - 1) // m) * m


def _policy_kernel_stoch(x_ref, w1_ref, b1_ref, w2_ref, b2_ref,
                         wh_ref, bh_ref, eps_ref, out_ref,
                         *, ap, matmul_dtype):
    """Fused MLP trunk + (mean | logstd) head + TanhNormal rsample epilogue."""
    cast = lambda a: a.astype(matmul_dtype)
    # MLP trunk: Linear + ReLU, twice (hidden_layer=2, dropout=0).  Weights arrive
    # pre-cast from the wrapper; only the per-tile activations are cast here.
    h = jnp.dot(cast(x_ref[...]), w1_ref[...],
                preferred_element_type=jnp.float32) + b1_ref[...]
    h = jnp.maximum(h, 0.0)
    h = jnp.dot(cast(h), w2_ref[...],
                preferred_element_type=jnp.float32) + b2_ref[...]
    h = jnp.maximum(h, 0.0)
    # Fused heads: one (H, 2*AP) matmul; AP is a multiple of 128, so both slices are
    # lane-aligned (no cross-lane relayout) and the output store is lane-dense.
    y = jnp.dot(cast(h), wh_ref[...],
                preferred_element_type=jnp.float32) + bh_ref[...]
    mean = y[:, :ap]
    logstd = jnp.clip(y[:, ap:], -20.0, 2.0)
    out_ref[...] = jnp.tanh(mean + jnp.exp(logstd) * eps_ref[...])


def _policy_kernel_det(x_ref, w1_ref, b1_ref, w2_ref, b2_ref,
                       wm_ref, bm_ref, out_ref, *, matmul_dtype):
    cast = lambda a: a.astype(matmul_dtype)
    h = jnp.dot(cast(x_ref[...]), w1_ref[...],
                preferred_element_type=jnp.float32) + b1_ref[...]
    h = jnp.maximum(h, 0.0)
    h = jnp.dot(cast(h), w2_ref[...],
                preferred_element_type=jnp.float32) + b2_ref[...]
    h = jnp.maximum(h, 0.0)
    mean = jnp.dot(cast(h), wm_ref[...],
                   preferred_element_type=jnp.float32) + bm_ref[...]
    out_ref[...] = jnp.tanh(mean)


def _default_tile(batch):
    """MXU-shaped batch tile; keeps >= 2 grid steps for v7x megacore on big batches."""
    bp8 = _round_up(batch, 8)
    if bp8 <= 128:
        return bp8      # single small tile; this regime is overhead/latency-bound
    if bp8 <= 512:
        return 128      # v5e MXU-shaped rows; 2-4 "parallel" steps for v7x megacore
    return 256          # v6e/v7x MXU-shaped rows (2x256x256), still >= 2 grid steps


def policy_forward(x, params, eps=None, *, deterministic=False, tb=None,
                   matmul_dtype=jnp.bfloat16):
    """Policy forward pass (continuous Box action space) as a Pallas TPU kernel.

    x:      (B, state_dim) float32 augmented states
    params: dict of weights (in_features, out_features) == torch_weight.T and
            biases (1, out_features), all float32
    eps:    (B, act_dim) float32 standard-normal noise (required if deterministic=False)
    matmul_dtype: bf16 (default; MXU-native on v6e/v7x, f32 accumulation + f32 epilogue)
            or jnp.float32 for bit-exact reference matching (e.g. training-time use).
    """
    x = jnp.asarray(x, jnp.float32)
    B, S = x.shape
    H = params["w1"].shape[1]
    A = params["wm"].shape[1]
    AP = _round_up(A, 128)          # lane-dense head / output width
    pad_a = AP - A

    if tb is None:
        tb = _default_tile(B)
    tb = max(8, _round_up(int(tb), 8))

    # Pad the batch so grid = Bp // tb works for any B; slice the result back.
    Bp = _round_up(B, tb)
    if Bp != B:
        x = jnp.pad(x, ((0, Bp - B), (0, 0)))
    grid = (Bp // tb,)

    # Pre-cast the replicated weights once in the wrapper (no per-grid-step VPU casts,
    # half the weight DMA bytes for bf16).  Biases stay f32 (matmuls accumulate in f32).
    w1 = params["w1"].astype(matmul_dtype)
    w2 = params["w2"].astype(matmul_dtype)
    b1 = params["b1"].astype(jnp.float32)
    b2 = params["b2"].astype(jnp.float32)

    def pad_head(w, b):
        if pad_a:
            w = jnp.pad(w, ((0, 0), (0, pad_a)))
            b = jnp.pad(b, ((0, 0), (0, pad_a)))
        return w, b

    # Replicated (constant index_map) blocks never need double buffering.
    def replicated(shape):
        return pl.BlockSpec(shape, lambda i: (0, 0), pipeline_mode=pl.Buffered(1))

    def row_spec(width):
        return pl.BlockSpec((tb, width), lambda i: (i, 0))

    if deterministic:
        wm, bm = pad_head(params["wm"].astype(jnp.float32),
                          params["bm"].astype(jnp.float32))
        wm = wm.astype(matmul_dtype)
        kernel = functools.partial(_policy_kernel_det, matmul_dtype=matmul_dtype)
        in_specs = [row_spec(S),
                    replicated((S, H)), replicated((1, H)),
                    replicated((H, H)), replicated((1, H)),
                    replicated((H, AP)), replicated((1, AP))]
        args = (x, w1, b1, w2, b2, wm, bm)
        head_cols = AP
        transcendentals = Bp * AP                  # tanh
    else:
        if eps is None:
            raise ValueError("eps of shape (B, act_dim) standard-normal noise is "
                             "required when deterministic=False")
        eps = jnp.asarray(eps, jnp.float32)
        if eps.shape != (B, A):
            raise ValueError(f"eps must have shape {(B, A)}, got {eps.shape}")
        # TODO(synk): optionally generate eps in-kernel (pltpu.prng_seed +
        # pltpu.prng_random_bits) from a scalar-prefetched seed to drop this DMA stream.
        eps = jnp.pad(eps, ((0, Bp - B), (0, pad_a)))
        wm, bm = pad_head(params["wm"].astype(jnp.float32),
                          params["bm"].astype(jnp.float32))
        wls, bls = pad_head(params["wls"].astype(jnp.float32),
                            params["bls"].astype(jnp.float32))
        wh = jnp.concatenate([wm, wls], axis=1).astype(matmul_dtype)   # (H, 2*AP)
        bh = jnp.concatenate([bm, bls], axis=1)                        # (1, 2*AP), f32
        kernel = functools.partial(_policy_kernel_stoch, ap=AP,
                                   matmul_dtype=matmul_dtype)
        in_specs = [row_spec(S),
                    replicated((S, H)), replicated((1, H)),
                    replicated((H, H)), replicated((1, H)),
                    replicated((H, 2 * AP)), replicated((1, 2 * AP)),
                    row_spec(AP)]
        args = (x, w1, b1, w2, b2, wh, bh, eps)
        head_cols = 2 * AP
        transcendentals = 2 * Bp * AP              # exp + tanh

    def nbytes(a):
        return int(np.prod(a.shape)) * jnp.dtype(a.dtype).itemsize

    flops = 2 * Bp * (S * H + H * H + H * head_cols)
    bytes_accessed = int(sum(nbytes(a) for a in args) + Bp * AP * 4)

    # VMEM budget: single-buffered weights/biases + double-buffered row tiles +
    # f32 intermediates + margin.  Raise the scoped limit only when needed (large H).
    weight_bytes = sum(nbytes(a) for a in args[1:7])
    tile_bytes = 2 * 4 * tb * (S + 2 * AP) + 4 * tb * (2 * H + head_cols)
    vmem_estimate = weight_bytes + tile_bytes + (1 << 20)
    vmem_limit = None
    if vmem_estimate > (32 << 20):
        # TODO(synk): for H large enough that single-buffered bf16 weights exceed
        # ~60 MiB, K-tile W2 over an extra "arbitrary" grid axis with a VMEM f32
        # accumulator instead of just raising the limit (v7x physical VMEM is 64 MiB).
        vmem_limit = int(min(vmem_estimate, 60 << 20))

    out = pl.pallas_call(
        kernel,
        out_shape=jax.ShapeDtypeStruct((Bp, AP), jnp.float32),
        grid_spec=pltpu.PrefetchScalarGridSpec(
            num_scalar_prefetch=0,
            grid=grid,
            in_specs=in_specs,
            out_specs=pl.BlockSpec((tb, AP), lambda i: (i, 0)),
        ),
        compiler_params=pltpu.CompilerParams(
            dimension_semantics=("parallel",),
            vmem_limit_bytes=vmem_limit),
        cost_estimate=pl.CostEstimate(flops=flops,
                                      transcendentals=transcendentals,
                                      bytes_accessed=bytes_accessed),
    )(*args)
    # Drop batch padding and the lane padding of the head (padded lanes hold tanh(0)).
    return out[:B, :A]


def init_params(key, state_dim, hidden_size, act_dim):
    """Deterministic init mimicking nn.Linear's uniform(-1/sqrt(fan_in), ...)."""
    def linear(k, fan_in, fan_out):
        kw, kb = jax.random.split(k)
        bound = 1.0 / np.sqrt(fan_in)
        w = jax.random.uniform(kw, (fan_in, fan_out), jnp.float32, -bound, bound)
        b = jax.random.uniform(kb, (1, fan_out), jnp.float32, -bound, bound)
        return w, b

    k1, k2, k3, k4 = jax.random.split(key, 4)
    w1, b1 = linear(k1, state_dim, hidden_size)
    w2, b2 = linear(k2, hidden_size, hidden_size)
    wm, bm = linear(k3, hidden_size, act_dim)
    wls, bls = linear(k4, hidden_size, act_dim)
    return dict(w1=w1, b1=b1, w2=w2, b2=b2, wm=wm, bm=bm, wls=wls, bls=bls)


def policy_forward_ref(x, p, eps, deterministic=False):
    h = jnp.maximum(x @ p["w1"] + p["b1"], 0.0)
    h = jnp.maximum(h @ p["w2"] + p["b2"], 0.0)
    mean = h @ p["wm"] + p["bm"]
    if deterministic:
        return jnp.tanh(mean)
    logstd = jnp.clip(h @ p["wls"] + p["bls"], -20.0, 2.0)
    return jnp.tanh(mean + jnp.exp(logstd) * eps)


if __name__ == "__main__":
    # Small deterministic shapes; B=50 is intentionally not a multiple of 8 to exercise
    # batch padding, and act_dim=8 (< 128) exercises the lane-dense head padding path.
    B, STATE_DIM, HIDDEN, ACT_DIM = 50, 32, 128, 8

    key = jax.random.PRNGKey(0)
    k_x, k_eps, k_params, k_x2, k_eps2 = jax.random.split(key, 5)

    x = jax.random.normal(k_x, (B, STATE_DIM), dtype=jnp.float32)
    eps = jax.random.normal(k_eps, (B, ACT_DIM), dtype=jnp.float32)   # rsample noise
    params = init_params(k_params, STATE_DIM, HIDDEN, ACT_DIM)

    ref = policy_forward_ref(x, params, eps, deterministic=False)
    ref_det = policy_forward_ref(x, params, eps, deterministic=True)

    # Exact (f32 matmul) path: stochastic (module default) and deterministic.
    out_f32 = jax.block_until_ready(
        policy_forward(x, params, eps, deterministic=False, matmul_dtype=jnp.float32))
    out_det_f32 = jax.block_until_ready(
        policy_forward(x, params, deterministic=True, matmul_dtype=jnp.float32))
    np.testing.assert_allclose(np.asarray(out_f32), np.asarray(ref),
                               rtol=1e-5, atol=1e-5)
    np.testing.assert_allclose(np.asarray(out_det_f32), np.asarray(ref_det),
                               rtol=1e-5, atol=1e-5)

    # Default path: bf16 matmul inputs (pre-cast weights, f32 accumulate/epilogue).
    out_bf16 = jax.block_until_ready(policy_forward(x, params, eps, deterministic=False))
    out_det_bf16 = jax.block_until_ready(policy_forward(x, params, deterministic=True))
    np.testing.assert_allclose(np.asarray(out_bf16), np.asarray(ref),
                               rtol=0.1, atol=0.1)
    np.testing.assert_allclose(np.asarray(out_det_bf16), np.asarray(ref_det),
                               rtol=0.1, atol=0.1)

    # Larger batch exercises the multi-tile grid (tb=128 -> 3 "parallel" steps).
    B2 = 384
    x2 = jax.random.normal(k_x2, (B2, STATE_DIM), dtype=jnp.float32)
    eps2 = jax.random.normal(k_eps2, (B2, ACT_DIM), dtype=jnp.float32)
    out2 = jax.block_until_ready(policy_forward(x2, params, eps2))
    ref2 = policy_forward_ref(x2, params, eps2, deterministic=False)
    np.testing.assert_allclose(np.asarray(out2), np.asarray(ref2), rtol=0.1, atol=0.1)

    # TODO(synk): discrete (Categorical) action branch — softmax head + argmax /
    # multinomial sampling — is not implemented; only the Box (continuous) branch is.
    print("KERNEL_OK")
</pallas_src>

<mosaic_0001>
module attributes {stable_mosaic.version = 11 : i64} {
  func.func @_policy_kernel_stoch(%arg0: i32, %arg1: memref<56x32xf32, #tpu.memory_space<vmem>>, %arg2: memref<32x128xf32, #tpu.memory_space<vmem>>, %arg3: memref<1x128xf32, #tpu.memory_space<vmem>>, %arg4: memref<128x128xf32, #tpu.memory_space<vmem>>, %arg5: memref<1x128xf32, #tpu.memory_space<vmem>>, %arg6: memref<128x256xf32, #tpu.memory_space<vmem>>, %arg7: memref<1x256xf32, #tpu.memory_space<vmem>>, %arg8: memref<56x128xf32, #tpu.memory_space<vmem>>, %arg9: memref<56x128xf32, #tpu.memory_space<vmem>>) attributes {dimension_semantics = [#tpu.dimension_semantics<parallel>], iteration_bounds = array<i64: 1>, scalar_prefetch = 0 : i64, scratch_operands = 0 : i64, tpu.core_type = #tpu.core_type<tc>, window_params = [{transform_indices = @transform_0, window_bounds = array<i64: 56, 32>}, {pipeline_mode = #tpu.pipeline_mode<synchronous>, transform_indices = @transform_1, window_bounds = array<i64: 32, 128>}, {pipeline_mode = #tpu.pipeline_mode<synchronous>, transform_indices = @transform_2, window_bounds = array<i64: 1, 128>}, {pipeline_mode = #tpu.pipeline_mode<synchronous>, transform_indices = @transform_3, window_bounds = array<i64: 128, 128>}, {pipeline_mode = #tpu.pipeline_mode<synchronous>, transform_indices = @transform_4, window_bounds = array<i64: 1, 128>}, {pipeline_mode = #tpu.pipeline_mode<synchronous>, transform_indices = @transform_5, window_bounds = array<i64: 128, 256>}, {pipeline_mode = #tpu.pipeline_mode<synchronous>, transform_indices = @transform_6, window_bounds = array<i64: 1, 256>}, {transform_indices = @transform_7, window_bounds = array<i64: 56, 128>}, {transform_indices = @transform_8, window_bounds = array<i64: 56, 128>}]} {
    %c0 = arith.constant 0 : index
    %c0_0 = arith.constant 0 : index
    %0 = vector.load %arg1[%c0, %c0_0] : memref<56x32xf32, #tpu.memory_space<vmem>>, vector<56x32xf32>
    %c0_1 = arith.constant 0 : index
    %c0_2 = arith.constant 0 : index
    %1 = vector.load %arg2[%c0_1, %c0_2] : memref<32x128xf32, #tpu.memory_space<vmem>>, vector<32x128xf32>
    %cst = arith.constant dense<0.000000e+00> : vector<56x128xf32>
    %2 = tpu.matmul %0, %1, %cst {dimension_numbers = #tpu.dot_dimension_numbers<[1], [0], [0], [1], [0, 0, 1, 1], [], []>} : vector<56x32xf32>, vector<32x128xf32>, vector<56x128xf32> -> vector<56x128xf32>
    %c0_3 = arith.constant 0 : index
    %c0_4 = arith.constant 0 : index
    %3 = vector.load %arg3[%c0_3, %c0_4] : memref<1x128xf32, #tpu.memory_space<vmem>>, vector<1x128xf32>
    %4 = vector.broadcast %3 : vector<1x128xf32> to vector<56x128xf32>
    %5 = arith.addf %2, %4 : vector<56x128xf32>
    %cst_5 = arith.constant 0.000000e+00 : f32
    %6 = vector.broadcast %cst_5 : f32 to vector<56x128xf32>
    %7 = arith.maximumf %5, %6 : vector<56x128xf32>
    %c0_6 = arith.constant 0 : index
    %c0_7 = arith.constant 0 : index
    %8 = vector.load %arg4[%c0_6, %c0_7] : memref<128x128xf32, #tpu.memory_space<vmem>>, vector<128x128xf32>
    %cst_8 = arith.constant dense<0.000000e+00> : vector<56x128xf32>
    %9 = tpu.matmul %7, %8, %cst_8 {dimension_numbers = #tpu.dot_dimension_numbers<[1], [0], [0], [1], [0, 0, 1, 1], [], []>} : vector<56x128xf32>, vector<128x128xf32>, vector<56x128xf32> -> vector<56x128xf32>
    %c0_9 = arith.constant 0 : index
    %c0_10 = arith.constant 0 : index
    %10 = vector.load %arg5[%c0_9, %c0_10] : memref<1x128xf32, #tpu.memory_space<vmem>>, vector<1x128xf32>
    %11 = vector.broadcast %10 : vector<1x128xf32> to vector<56x128xf32>
    %12 = arith.addf %9, %11 : vector<56x128xf32>
    %cst_11 = arith.constant 0.000000e+00 : f32
    %13 = vector.broadcast %cst_11 : f32 to vector<56x128xf32>
    %14 = arith.maximumf %12, %13 : vector<56x128xf32>
    %c0_12 = arith.constant 0 : index
    %c0_13 = arith.constant 0 : index
    %15 = vector.load %arg6[%c0_12, %c0_13] : memref<128x256xf32, #tpu.memory_space<vmem>>, vector<128x256xf32>
    %cst_14 = arith.constant dense<0.000000e+00> : vector<56x256xf32>
    %16 = tpu.matmul %14, %15, %cst_14 {dimension_numbers = #tpu.dot_dimension_numbers<[1], [0], [0], [1], [0, 0, 1, 1], [], []>} : vector<56x128xf32>, vector<128x256xf32>, vector<56x256xf32> -> vector<56x256xf32>
    %c0_15 = arith.constant 0 : index
    %c0_16 = arith.constant 0 : index
    %17 = vector.load %arg7[%c0_15, %c0_16] : memref<1x256xf32, #tpu.memory_space<vmem>>, vector<1x256xf32>
    %18 = vector.broadcast %17 : vector<1x256xf32> to vector<56x256xf32>
    %19 = arith.addf %16, %18 : vector<56x256xf32>
    %20 = vector.extract_strided_slice %19 {offsets = [0, 0], sizes = [56, 128], strides = [1, 1]} : vector<56x256xf32> to vector<56x128xf32>
    %21 = vector.extract_strided_slice %19 {offsets = [0, 128], sizes = [56, 128], strides = [1, 1]} : vector<56x256xf32> to vector<56x128xf32>
    %cst_17 = arith.constant -2.000000e+01 : f32
    %cst_18 = arith.constant 2.000000e+00 : f32
    %22 = vector.broadcast %cst_17 : f32 to vector<56x128xf32>
    %23 = arith.maximumf %22, %21 : vector<56x128xf32>
    %24 = vector.broadcast %cst_18 : f32 to vector<56x128xf32>
    %25 = arith.minimumf %24, %23 : vector<56x128xf32>
    %26 = math.exp %25 : vector<56x128xf32>
    %c0_19 = arith.constant 0 : index
    %c0_20 = arith.constant 0 : index
    %27 = vector.load %arg8[%c0_19, %c0_20] : memref<56x128xf32, #tpu.memory_space<vmem>>, vector<56x128xf32>
    %28 = arith.mulf %26, %27 : vector<56x128xf32>
    %29 = arith.addf %20, %28 : vector<56x128xf32>
    %30 = math.tanh %29 : vector<56x128xf32>
    %c0_21 = arith.constant 0 : index
    %c0_22 = arith.constant 0 : index
    %31 = vector.load %arg9[%c0_21, %c0_22] : memref<56x128xf32, #tpu.memory_space<vmem>>, vector<56x128xf32>
    tpu.vector_store %arg9[%c0_21, %c0_22], %30 {strides = array<i32>} : memref<56x128xf32, #tpu.memory_space<vmem>>, vector<56x128xf32>,
    return
  }
  func.func @transform_0(%arg0: i32) -> (i32, i32) {
    %c0_i32 = arith.constant 0 : i32
    %c0_i32_0 = arith.constant 0 : i32
    return %arg0, %c0_i32 : i32, i32
  }
  func.func @transform_1(%arg0: i32) -> (i32, i32) {
    %c0_i32 = arith.constant 0 : i32
    %c0_i32_0 = arith.constant 0 : i32
    %c0_i32_1 = arith.constant 0 : i32
    return %c0_i32, %c0_i32_0 : i32, i32
  }
  func.func @transform_2(%arg0: i32) -> (i32, i32) {
    %c0_i32 = arith.constant 0 : i32
    %c0_i32_0 = arith.constant 0 : i32
    %c0_i32_1 = arith.constant 0 : i32
    return %c0_i32, %c0_i32_0 : i32, i32
  }
  func.func @transform_3(%arg0: i32) -> (i32, i32) {
    %c0_i32 = arith.constant 0 : i32
    %c0_i32_0 = arith.constant 0 : i32
    %c0_i32_1 = arith.constant 0 : i32
    return %c0_i32, %c0_i32_0 : i32, i32
  }
  func.func @transform_4(%arg0: i32) -> (i32, i32) {
    %c0_i32 = arith.constant 0 : i32
    %c0_i32_0 = arith.constant 0 : i32
    %c0_i32_1 = arith.constant 0 : i32
    return %c0_i32, %c0_i32_0 : i32, i32
  }
  func.func @transform_5(%arg0: i32) -> (i32, i32) {
    %c0_i32 = arith.constant 0 : i32
    %c0_i32_0 = arith.constant 0 : i32
    %c0_i32_1 = arith.constant 0 : i32
    return %c0_i32, %c0_i32_0 : i32, i32
  }
  func.func @transform_6(%arg0: i32) -> (i32, i32) {
    %c0_i32 = arith.constant 0 : i32
    %c0_i32_0 = arith.constant 0 : i32
    %c0_i32_1 = arith.constant 0 : i32
    return %c0_i32, %c0_i32_0 : i32, i32
  }
  func.func @transform_7(%arg0: i32) -> (i32, i32) {
    %c0_i32 = arith.constant 0 : i32
    %c0_i32_0 = arith.constant 0 : i32
    return %arg0, %c0_i32 : i32, i32
  }
  func.func @transform_8(%arg0: i32) -> (i32, i32) {
    %c0_i32 = arith.constant 0 : i32
    %c0_i32_0 = arith.constant 0 : i32
    return %arg0, %c0_i32 : i32, i32
  }
}

</mosaic_0001>

<bundles_post_ra>
// kernel: tpu_custom_call.1
= control target key start
LH: loop header
LB: loop body
LE: loop exit
PB: predicated region body
PF: predicated region fallthrough
CT: control target
= control target key end

     0   :  { %13 = vsyncpa [#allocation3], 0  ;;  %s1085_s0 = inlined_call_operand.vmem [shape: f32[56,32], index: 0, kind: input, shape index: {}]   ;;  %s1086_s1 = inlined_call_operand.vmem [shape: f32[32,128], index: 1, kind: input, shape index: {}]   ;;  %s1087_s2 = inlined_call_operand.vmem [shape: f32[1,128], index: 2, kind: input, shape index: {}]   ;;  %s1088_s3 = inlined_call_operand.hbm [shape: f32[128,128], index: 3, kind: input, shape index: {}]   ;;  %s1089_s4 = inlined_call_operand.vmem [shape: f32[1,128], index: 4, kind: input, shape index: {}]   ;;  %s1090_s5 = inlined_call_operand.hbm [shape: f32[128,256], index: 5, kind: input, shape index: {}]   ;;  %s1091_s6 = inlined_call_operand.vmem [shape: f32[1,256], index: 6, kind: input, shape index: {}]   ;;  %s1092_s7 = inlined_call_operand.vmem [shape: f32[56,128], index: 7, kind: input, shape index: {}]   ;;  %s1093_s8 = inlined_call_operand.hbm [shape: f32[56,128], index: 8, kind: output, shape index: {}]  }
   0x1   :  { %14 = vsyncpa [#allocation6], 0 }
   0x2   :  { %15 = vsyncpa [#allocation4], 0  ;;  %s864_s27 = smov [#allocation2]   ;;  %s792_s9 = scalar_lea.hbm %s1088_s3, 2048 }
   0x3   :  { %s27_s28 = sshll.u32 %s864_s27, 4  ;;  %p793_p0 = scmp.ne.s32.totalorder %s1088_s3, %s792_s9  ;;  %s28_s28 = int_to_ptr.vmem [resolvable:$true] %s27_s28 }
   0x4   :  { %p796_p1 = scmp.lt.u32.totalorder %s792_s9, %s1088_s3 }
   0x6   :  { %p798_p2 = pnand %p796_p1, %p793_p0 }
   0x8   :  { %801 = shalt.err (!%p798_p2)
}
   0x9   :  { %s802_s14 = scalar_lea.vmem %s28_s28, 2048  ;;  %p807_p4 = scmp.lt.s32.totalorder %s28_s28, %s28_s28 }
   0xa   :  { %p803_p3 = scmp.ne.s32.totalorder %s28_s28, %s802_s14  ;;  %p808_p5 = scmp.lt.s32.totalorder %s802_s14, %s802_s14 }
   0xc   :  { %p809_p6 = por %p808_p5, %p807_p4 }
   0xe   :  { %p810_p7 = pnand %p809_p6, %p803_p3 }
  0x10   :  { %813 = shalt.err (!%p810_p7)
}
  0x11   :  { %s865_s15 = smov 128   ;;  %s866_s16 = smov 8  }
  0x12   :  { %33 = dma.hbm_to_vmem [thread:$0]  %s1088_s3, 2048, %s28_s28, [#allocation3], %s865_s15, %s865_s15, %s866_s16  }
  0x13   :  { %s867_s19 = smov [#allocation5]   ;;  %s814_s23 = scalar_lea.hbm %s1090_s5, 4096 }
  0x14   :  { %s41_s20 = sshll.u32 %s867_s19, 4  ;;  %p815_p8 = scmp.ne.s32.totalorder %s1090_s5, %s814_s23  ;;  %s42_s20 = int_to_ptr.vmem [resolvable:$true] %s41_s20 }
  0x15   :  { %p818_p9 = scmp.lt.u32.totalorder %s814_s23, %s1090_s5 }
  0x17   :  { %p820_p10 = pnand %p818_p9, %p815_p8 }
  0x19   :  { %823 = shalt.err (!%p820_p10)
}
  0x1a   :  { %s824_s29 = scalar_lea.vmem %s42_s20, 4096  ;;  %p829_p12 = scmp.lt.s32.totalorder %s42_s20, %s42_s20 }
  0x1b   :  { %p825_p11 = scmp.ne.s32.totalorder %s42_s20, %s824_s29  ;;  %p830_p13 = scmp.lt.s32.totalorder %s824_s29, %s824_s29 }
  0x1d   :  { %p831_p0 = por %p830_p13, %p829_p12 }
  0x1f   :  { %p832_p1 = pnand %p831_p0, %p825_p11 }
  0x21   :  { %835 = shalt.err (!%p832_p1)
}
  0x22   :  { %s868_s3 = smov 256   ;;  %s869_s28 = smov 16  }
  0x23   :  { %47 = dma.hbm_to_vmem [thread:$0]  %s1090_s5, 4096, %s42_s20, [#allocation6], %s868_s3, %s868_s3, %s869_s28  }
  0x24   :  { %858 = dma.done.wait [#allocation3], 2048  }
  0x25   :  { %859 = vsyncadd [#allocation3], 4294965248 }
  0x26   :  { %860 = dma.done.wait [#allocation6], 4096  }
  0x27   :  { %861 = vsyncadd [#allocation6], 4294963200  ;;  %v870_v0 = vmov 0.0|0.0   ;;  %vm871_vm0 = vmmov 0   ;;  %v872_v1 = vmov 0.0   ;;  %v65_v2 = vld [vmem:[%s1086_s1] sm:$0xff] }
  0x28   :  { %692 = vmatprep.subr.bf16.mxu0 %v870_v0  ;;  %618 = vmatprep.mubr.msk.f32.mxu0 %vm871_vm0, %v872_v1  ;;  %v66_v3 = vld [vmem:[%s1086_s1 + $0x8] sm:$0xff]  ;;  %v67_v4 = vld [vmem:[%s1086_s1 + $0x10] sm:$0xff]  ;;  %v68_v6 = vld [vmem:[%s1086_s1 + $0x18] sm:$0xff]  ;;  %vm76_vm1 = vcmask 261120   ;;  %s873_s25 = smov [#allocation7]  }
  0x29   :  { %698 = vmatprep.subr.bf16.mxu1 %v870_v0  ;;  %671 = vmatprep.mubr.msk.f32.mxu1 %vm871_vm0, %v872_v1  ;;  %v693_v5 = vpack.c.bf16 %v66_v3, %v65_v2  ;;  %v696_v7 = vpack.c.bf16 %v68_v6, %v67_v4  ;;  %v205_v8 = vld [vmem:[#allocation2] sm:$0xff]  ;;  %v206_v9 = vld [vmem:[#allocation2 + $0x8] sm:$0xff]  ;;  %v207_v10 = vld [vmem:[#allocation2 + $0x10] sm:$0xff]  ;;  %s554_s26 = sshll.u32 %s873_s25, 4  ;;  %s555_s26 = int_to_ptr.vmem [resolvable:$true] %s554_s26 }
  0x2a   :  { %v208_v11 = vld [vmem:[#allocation2 + $0x18] sm:$0xff]  ;;  %v699_v12 = vpack.c.bf16 %v206_v9, %v205_v8  ;;  %v58_v13 = vld [vmem:[%s1085_s0] sm:$0xff]  ;;  %v209_v15 = vld [vmem:[#allocation2 + $0x20] sm:$0xff]  ;;  %p841_p3 = scmp.lt.s32.totalorder %s555_s26, %s555_s26 }
  0x2b   :  { %694 = vmatpush3.bf16.msra.mxu0 %v693_v5  ;;  %v702_v14 = vpack.c.bf16 %v208_v11, %v207_v10  ;;  %v210_v16 = vld [vmem:[#allocation2 + $0x28] sm:$0xff]  ;;  %v59_v17 = vld [vmem:[%s1085_s0 + $0x8] sm:$0xff]  ;;  %v212_v20 = vld [vmem:[#allocation2 + $0x38] sm:$0xff] }
  0x2c   :  { %695 = vmatprep.subr.bf16.mxu0 %v870_v0  ;;  %700 = vmatpush3.bf16.msra.mxu1 %v699_v12  ;;  %v705_v18 = vpack.c.bf16 %v210_v16, %v209_v15  ;;  %v211_v19 = vld [vmem:[#allocation2 + $0x30] sm:$0xff]  ;;  %v60_v21 = vld [vmem:[%s1085_s0 + $0x10] sm:$0xff]  ;;  %v213_v23 = vld [vmem:[#allocation2 + $0x40] sm:$0xff] }
  0x2d   :  { %701 = vmatprep.subr.bf16.mxu1 %v870_v0  ;;  %v708_v22 = vpack.c.bf16 %v212_v20, %v211_v19  ;;  %v214_v24 = vld [vmem:[#allocation2 + $0x48] sm:$0xff]  ;;  %v61_v25 = vld [vmem:[%s1085_s0 + $0x18] sm:$0xff]  ;;  %v215_v27 = vld [vmem:[#allocation2 + $0x50] sm:$0xff] }
  0x2e   :  { %v711_v26 = vpack.c.bf16 %v214_v24, %v213_v23  ;;  %v216_v28 = vld [vmem:[#allocation2 + $0x58] sm:$0xff]  ;;  %v62_v29 = vld [vmem:[%s1085_s0 + $0x20] sm:$0xff]  ;;  %v217_v31 = vld [vmem:[#allocation2 + $0x60] sm:$0xff] }
  0x2f   :  { %697 = vmatpush3.bf16.msra.mxu0 %v696_v7  ;;  %v714_v30 = vpack.c.bf16 %v216_v28, %v215_v27  ;;  %v218_v32 = vld [vmem:[#allocation2 + $0x68] sm:$0xff]  ;;  %v63_v33 = vld [vmem:[%s1085_s0 + $0x28] sm:$0xff]  ;;  %v64_v35 = vld [vmem:[%s1085_s0 + $0x30] sm:$0xff] }
  0x30   :  { %703 = vmatpush3.bf16.msra.mxu1 %v702_v14  ;;  %v717_v34 = vpack.c.bf16 %v218_v32, %v217_v31  ;;  %v219_v36 = vld [vmem:[#allocation2 + $0x70] sm:$0xff]  ;;  %v220_v37 = vld [vmem:[#allocation2 + $0x78] sm:$0xff]  ;;  %v336_v39 = vld [vmem:[#allocation5 + $0x8] sm:$0xff] }
  0x31   :  { %704 = vmatprep.subr.bf16.mxu1 %v870_v0  ;;  %v720_v38 = vpack.c.bf16 %v220_v37, %v219_v36  ;;  %v338_v40 = vld [vmem:[#allocation5 + $0x18] sm:$0xff]  ;;  %v335_v41 = vld [vmem:[#allocation5] sm:$0xff]  ;;  %v337_v43 = vld [vmem:[#allocation5 + $0x10] sm:$0xff] }
  0x32   :  { %619 = vmatmul.mubr.msk.f32.vlgmr.msra.gmra.mrb[0].mxu0 %vm76_vm1, %v58_v13  ;;  %v722_v42 = vpack.c.bf16 %v338_v40, %v336_v39  ;;  %v340_v44 = vld [vmem:[#allocation5 + $0x28] sm:$0xff]  ;;  %v342_v45 = vld [vmem:[#allocation5 + $0x38] sm:$0xff]  ;;  %v724_v46 = vpack.c.bf16 %v337_v43, %v335_v41  ;;  %v339_v48 = vld [vmem:[#allocation5 + $0x20] sm:$0xff] }
  0x33   :  { %621 = vmatprep.mubr.msk.f32.mxu0 %vm871_vm0, %v872_v1  ;;  %v726_v47 = vpack.c.bf16 %v342_v45, %v340_v44  ;;  %v341_v49 = vld [vmem:[#allocation5 + $0x30] sm:$0xff]  ;;  %v344_v50 = vld [vmem:[#allocation5 + $0x48] sm:$0xff]  ;;  %v346_v51 = vld [vmem:[#allocation5 + $0x58] sm:$0xff] }
  0x34   :  { %706 = vmatpush3.bf16.msra.mxu1 %v705_v18  ;;  %723 = vmatprep.subr.bf16.mxu0 %v722_v42  ;;  %v728_v52 = vpack.c.bf16 %v341_v49, %v339_v48  ;;  %v730_v53 = vpack.c.bf16 %v346_v51, %v344_v50  ;;  %v343_v54 = vld [vmem:[#allocation5 + $0x40] sm:$0xff]  ;;  %v345_v55 = vld [vmem:[#allocation5 + $0x50] sm:$0xff]  ;;  %v348_v56 = vld [vmem:[#allocation5 + $0x68] sm:$0xff] }
  0x35   :  { %707 = vmatprep.subr.bf16.mxu1 %v870_v0  ;;  %725 = vmatpush1.bf16.msra.mxu0 %v724_v46  ;;  %v350_v57 = vld [vmem:[#allocation5 + $0x78] sm:$0xff]  ;;  %v732_v58 = vpack.c.bf16 %v345_v55, %v343_v54  ;;  %v347_v60 = vld [vmem:[#allocation5 + $0x60] sm:$0xff]  ;;  %v349_v61 = vld [vmem:[#allocation5 + $0x70] sm:$0xff] }
  0x36   :  { %622 = vmatmul.mubr.msk.f32.gmra.mrb[2].mxu0 %vm76_vm1, %v59_v17  ;;  %727 = vmatprep.subr.bf16.mxu0 %v726_v47  ;;  %v734_v59 = vpack.c.bf16 %v350_v57, %v348_v56  ;;  %v352_v62 = vld [vmem:[#allocation5 + $0x88] sm:$0xff]  ;;  %v354_v63 = vld [vmem:[#allocation5 + $0x98] sm:$0xff]  ;;  %v351_v3 = vld [vmem:[#allocation5 + $0x80] sm:$0xff] }
  0x37   :  { %624 = vmatprep.mubr.msk.f32.mxu0 %vm871_vm0, %v872_v1  ;;  %v738_v2 = vpack.c.bf16 %v354_v63, %v352_v62  ;;  %v353_v4 = vld [vmem:[#allocation5 + $0x90] sm:$0xff]  ;;  %v356_v5 = vld [vmem:[#allocation5 + $0xa8] sm:$0xff]  ;;  %v358_v6 = vld [vmem:[#allocation5 + $0xb8] sm:$0xff] }
  0x38   :  { %709 = vmatpush3.bf16.msra.mxu1 %v708_v22  ;;  %v740_v7 = vpack.c.bf16 %v353_v4, %v351_v3  ;;  %v742_v8 = vpack.c.bf16 %v358_v6, %v356_v5  ;;  %v355_v9 = vld [vmem:[#allocation5 + $0xa0] sm:$0xff]  ;;  %v357_v10 = vld [vmem:[#allocation5 + $0xb0] sm:$0xff]  ;;  %v360_v11 = vld [vmem:[#allocation5 + $0xc8] sm:$0xff] }
  0x39   :  { %710 = vmatprep.subr.bf16.mxu1 %v870_v0  ;;  %729 = vmatpush1.bf16.msra.mxu0 %v728_v52  ;;  %v362_v12 = vld [vmem:[#allocation5 + $0xd8] sm:$0xff]  ;;  %v744_v13 = vpack.c.bf16 %v357_v10, %v355_v9  ;;  %v359_v15 = vld [vmem:[#allocation5 + $0xc0] sm:$0xff]  ;;  %v361_v16 = vld [vmem:[#allocation5 + $0xd0] sm:$0xff] }
  0x3a   :  { %625 = vmatmul.mubr.msk.f32.gmra.mrb[4].mxu0 %vm76_vm1, %v60_v21  ;;  %731 = vmatprep.subr.bf16.mxu0 %v730_v53  ;;  %v746_v14 = vpack.c.bf16 %v362_v12, %v360_v11  ;;  %v748_v17 = vpack.c.bf16 %v361_v16, %v359_v15  ;;  %v567_v18 = vld [vmem:[%s1087_s2] ss:$0 sm:$0xff]  ;;  %v366_v48 = vld [vmem:[#allocation5 + $0xf8] sm:$0xff]  ;;  %v363_v50 = vld [vmem:[#allocation5 + $0xe0] sm:$0xff] }
  0x3b   :  { %627 = vmatprep.mubr.msk.f32.mxu0 %vm871_vm0, %v872_v1  ;;  %v364_v47 = vld [vmem:[#allocation5 + $0xe8] sm:$0xff]  ;;  %v365_v51 = vld [vmem:[#allocation5 + $0xf0] sm:$0xff] }
  0x3c   :  { %712 = vmatpush3.bf16.msra.mxu1 %v711_v26  ;;  %v750_v49 = vpack.c.bf16 %v366_v48, %v364_v47  ;;  %v752_v52 = vpack.c.bf16 %v365_v51, %v363_v50  ;;  %v575_v53 = vld [vmem:[%s1089_s4] ss:$0 sm:$0xff] }
  0x3d   :  { %713 = vmatprep.subr.bf16.mxu1 %v870_v0  ;;  %733 = vmatpush1.bf16.msra.mxu0 %v732_v58 }
  0x3e   :  { %628 = vmatmul.mubr.msk.f32.gmra.mrb[6].mxu0 %vm76_vm1, %v61_v25  ;;  %735 = vmatprep.subr.bf16.mxu0 %v734_v59 }
  0x3f   :  { %630 = vmatprep.mubr.msk.f32.mxu0 %vm871_vm0, %v872_v1 }
  0x40   :  { %715 = vmatpush3.bf16.msra.mxu1 %v714_v30 }
  0x41   :  { %716 = vmatprep.subr.bf16.mxu1 %v870_v0 }
  0x42   :  { %631 = vmatmul.mubr.msk.f32.gmra.mrb[8].mxu0 %vm76_vm1, %v62_v29 }
  0x43   :  { %633 = vmatprep.mubr.msk.f32.mxu0 %vm871_vm0, %v872_v1 }
  0x44   :  { %718 = vmatpush3.bf16.msra.mxu1 %v717_v34 }
  0x45   :  { %719 = vmatprep.subr.bf16.mxu1 %v870_v0  ;;  %v736_v0 = vpack.c.bf16 %v349_v61, %v347_v60 }
  0x46   :  { %634 = vmatmul.mubr.msk.f32.gmra.mrb[10].mxu0 %vm76_vm1, %v63_v33 }
  0x47   :  { %636 = vmatprep.mubr.msk.f32.mxu0 %vm871_vm0, %v872_v1  ;;  %737 = vmatpush1.bf16.msra.mxu0 %v736_v0 }
  0x48   :  { %721 = vmatpush3.bf16.msra.mxu1 %v720_v38  ;;  %739 = vmatprep.subr.bf16.mxu0 %v738_v2 }
  0x4a   :  { %637 = vmatmul.mubr.msk.f32.gmra.mrb[12].mxu0 %vm76_vm1, %v64_v35 }
  0x4b   :  { %443 = vmatprep.mubr.f32.mxu0 %v872_v1  ;;  %741 = vmatpush1.bf16.msra.mxu0 %v740_v7 }
  0x4c   :  { %743 = vmatprep.subr.bf16.mxu0 %v742_v8 }
  0x4f   :  { %745 = vmatpush1.bf16.msra.mxu0 %v744_v13 }
  0x50   :  { %747 = vmatprep.subr.bf16.mxu0 %v746_v14 }
  0x53   :  { %749 = vmatpush1.bf16.msra.mxu0 %v748_v17 }
  0x54   :  { %751 = vmatprep.subr.bf16.mxu0 %v750_v49  ;;  %v514_v49 = vld [vmem:[%s1092_s7] sm:$0xff] }
  0x57   :  { %753 = vmatpush1.bf16.msra.mxu0 %v752_v52 }
 0x105   :  { %v164_v19 = vpop.f32.mrb[0].mxu0 }
 0x106   :  { %v165_v20 = vadd.f32 %v567_v18, %v164_v19  ;;  %v620_v21 = vpop.f32.mrb[1].mxu0  ;;  %v369_v19 = vlaneseq }
 0x108   :  { %v198_v22 = vmax.f32 %v165_v20, 0.0  ;;  %v370_v20 = vshrl.u32 %v369_v19, 7 }
 0x109   :  { %v169_v23 = vpop.f32.mrb[2].mxu0 }
 0x10a   :  { %v170_v24 = vadd.f32 %v567_v18, %v169_v23  ;;  %v623_v25 = vpop.f32.mrb[3].mxu0  ;;  %672 = vmatmul.mubr.f32.vlgmr.msra.gmra.mrb[0].mxu1 %v198_v22  ;;  %v375_v21 = vsub.s32 1, %v370_v20  ;;  %v367_v22 = vld [vmem:[%s1091_s6] sm:$0x3] }
 0x10b   :  { %674 = vmatprep.mubr.msk.f32.mxu1 %vm871_vm0, %v872_v1 }
 0x10c   :  { %v199_v26 = vmax.f32 %v170_v24, 0.0  ;;  %v376_v23 = vrot.slane %v367_v22, %v375_v21 }
 0x10d   :  { %v174_v27 = vpop.f32.mrb[4].mxu0 }
 0x10e   :  { %v175_v28 = vadd.f32 %v567_v18, %v174_v27  ;;  %v626_v29 = vpop.f32.mrb[5].mxu0  ;;  %675 = vmatmul.mubr.f32.gmra.mrb[2].mxu1 %v199_v26 }
 0x10f   :  { %677 = vmatprep.mubr.msk.f32.mxu1 %vm871_vm0, %v872_v1 }
 0x110   :  { %v200_v30 = vmax.f32 %v175_v28, 0.0 }
 0x111   :  { %v179_v31 = vpop.f32.mrb[6].mxu0 }
 0x112   :  { %v180_v32 = vadd.f32 %v567_v18, %v179_v31  ;;  %v629_v33 = vpop.f32.mrb[7].mxu0  ;;  %678 = vmatmul.mubr.f32.gmra.mrb[4].mxu1 %v200_v30 }
 0x113   :  { %680 = vmatprep.mubr.msk.f32.mxu1 %vm871_vm0, %v872_v1 }
 0x114   :  { %v201_v34 = vmax.f32 %v180_v32, 0.0 }
 0x115   :  { %v184_v35 = vpop.f32.mrb[8].mxu0 }
 0x116   :  { %v185_v36 = vadd.f32 %v567_v18, %v184_v35  ;;  %v632_v37 = vpop.f32.mrb[9].mxu0  ;;  %681 = vmatmul.mubr.f32.gmra.mrb[6].mxu1 %v201_v34 }
 0x117   :  { %683 = vmatprep.mubr.msk.f32.mxu1 %vm871_vm0, %v872_v1 }
 0x118   :  { %v202_v38 = vmax.f32 %v185_v36, 0.0 }
 0x119   :  { %v189_v39 = vpop.f32.mrb[10].mxu0 }
 0x11a   :  { %v190_v40 = vadd.f32 %v567_v18, %v189_v39  ;;  %v635_v41 = vpop.f32.mrb[11].mxu0  ;;  %684 = vmatmul.mubr.f32.gmra.mrb[8].mxu1 %v202_v38 }
 0x11b   :  { %686 = vmatprep.mubr.msk.f32.mxu1 %vm871_vm0, %v872_v1 }
 0x11c   :  { %v203_v42 = vmax.f32 %v190_v40, 0.0  ;;  %v371_v40 = vsub.s32 0, %v370_v20 }
 0x11d   :  { %v194_v43 = vpop.f32.mrb[12].mxu0 }
 0x11e   :  { %v195_v44 = vadd.f32 %v567_v18, %v194_v43  ;;  %v638_v45 = vpop.f32.mrb[13].mxu0  ;;  %687 = vmatmul.mubr.f32.gmra.mrb[10].mxu1 %v203_v42  ;;  %v1040_v47 = vrot.slane %v367_v22, %v371_v40 }
 0x11f   :  { %689 = vmatprep.mubr.msk.f32.mxu1 %vm871_vm0, %v872_v1 }
 0x120   :  { %v204_v46 = vmax.f32 %v195_v44, 0.0 }
 0x122   :  { %690 = vmatmul.mubr.f32.gmra.mrb[12].mxu1 %v204_v46 }
 0x1dd   :  { %v294_v54 = vpop.f32.mrb[0].mxu1 }
 0x1de   :  { %v295_v55 = vadd.f32 %v575_v53, %v294_v54  ;;  %v673_v56 = vpop.f32.mrb[1].mxu1 }
 0x1e0   :  { %v328_v57 = vmax.f32 %v295_v55, 0.0 }
 0x1e1   :  { %v299_v58 = vpop.f32.mrb[2].mxu1 }
 0x1e2   :  { %v300_v59 = vadd.f32 %v575_v53, %v299_v58  ;;  %v676_v60 = vpop.f32.mrb[3].mxu1  ;;  %444 = vmatmul.mubr.f32.vlgmr.msra.gmra.mrb[14].mxu0 %v328_v57 }
 0x1e3   :  { %449 = vmatprep.mubr.f32.mxu0 %v872_v1 }
 0x1e4   :  { %v329_v61 = vmax.f32 %v300_v59, 0.0  ;;  %v515_v59 = vld [vmem:[%s1092_s7 + $0x8] sm:$0xff] }
 0x1e5   :  { %v304_v62 = vpop.f32.mrb[4].mxu1 }
 0x1e6   :  { %v305_v63 = vadd.f32 %v575_v53, %v304_v62  ;;  %v679_v0 = vpop.f32.mrb[5].mxu1  ;;  %450 = vmatmul.mubr.f32.gmra.mrb[16].mxu0 %v329_v61 }
 0x1e7   :  { %455 = vmatprep.mubr.f32.mxu0 %v872_v1 }
 0x1e8   :  { %v330_v2 = vmax.f32 %v305_v63, 0.0 }
 0x1e9   :  { %v309_v3 = vpop.f32.mrb[6].mxu1 }
 0x1ea   :  { %v310_v4 = vadd.f32 %v575_v53, %v309_v3  ;;  %v682_v5 = vpop.f32.mrb[7].mxu1  ;;  %456 = vmatmul.mubr.f32.gmra.mrb[18].mxu0 %v330_v2 }
 0x1eb   :  { %461 = vmatprep.mubr.f32.mxu0 %v872_v1 }
 0x1ec   :  { %v331_v6 = vmax.f32 %v310_v4, 0.0 }
 0x1ed   :  { %v314_v7 = vpop.f32.mrb[8].mxu1 }
 0x1ee   :  { %v315_v8 = vadd.f32 %v575_v53, %v314_v7  ;;  %v685_v9 = vpop.f32.mrb[9].mxu1  ;;  %462 = vmatmul.mubr.f32.gmra.mrb[20].mxu0 %v331_v6  ;;  %v516_v7 = vld [vmem:[%s1092_s7 + $0x10] sm:$0xff] }
 0x1ef   :  { %467 = vmatprep.mubr.f32.mxu0 %v872_v1 }
 0x1f0   :  { %v332_v10 = vmax.f32 %v315_v8, 0.0 }
 0x1f1   :  { %v319_v11 = vpop.f32.mrb[10].mxu1 }
 0x1f2   :  { %v320_v12 = vadd.f32 %v575_v53, %v319_v11  ;;  %v688_v13 = vpop.f32.mrb[11].mxu1  ;;  %468 = vmatmul.mubr.f32.gmra.mrb[22].mxu0 %v332_v10 }
 0x1f3   :  { %473 = vmatprep.mubr.f32.mxu0 %v872_v1 }
 0x1f4   :  { %v333_v14 = vmax.f32 %v320_v12, 0.0 }
 0x1f5   :  { %v324_v15 = vpop.f32.mrb[12].mxu1 }
 0x1f6   :  { %v325_v16 = vadd.f32 %v575_v53, %v324_v15  ;;  %v691_v17 = vpop.f32.mrb[13].mxu1  ;;  %474 = vmatmul.mubr.f32.gmra.mrb[24].mxu0 %v333_v14 }
 0x1f7   :  { %479 = vmatprep.mubr.f32.mxu0 %v872_v1 }
 0x1f8   :  { %v334_v18 = vmax.f32 %v325_v16, 0.0  ;;  %v517_v16 = vld [vmem:[%s1092_s7 + $0x18] sm:$0xff] }
 0x1fa   :  { %480 = vmatmul.mubr.f32.gmra.mrb[26].mxu0 %v334_v18 }
 0x2b5   :  { %v445_v24 = vpop.f32.mrb[14].mxu0 }
 0x2b6   :  { %v447_v25 = vpop.f32.mrb[15].mxu0  ;;  %v446_v56 = vadd.f32 %v445_v24, %v1040_v47 }
 0x2b7   :  { %v448_v26 = vadd.f32 %v447_v25, %v376_v23 }
 0x2b9   :  { %v486_v27 = vmax.f32 %v448_v26, -20.0  ;;  %v451_v28 = vpop.f32.mrb[16].mxu0 }
 0x2ba   :  { %v453_v29 = vpop.f32.mrb[17].mxu0  ;;  %v452_v4 = vadd.f32 %v451_v28, %v1040_v47 }
 0x2bb   :  { %v493_v30 = vmin.f32 %v486_v27, 2.0  ;;  %v454_v31 = vadd.f32 %v453_v29, %v376_v23  ;;  %v519_v29 = vld [vmem:[%s1092_s7 + $0x28] sm:$0xff] }
 0x2bd   :  { %v500_v32 = vmul.f32 1.442695, %v493_v30  ;;  %v487_v1 = vmax.f32 %v454_v31, -20.0  ;;  %v457_v33 = vpop.f32.mrb[18].mxu0 }
 0x2be   :  { %v459_v34 = vpop.f32.mrb[19].mxu0  ;;  %v458_v14 = vadd.f32 %v457_v33, %v1040_v47 }
 0x2bf   :  { %764 = vpow2.f32 %v500_v32  ;;  %v494_v35 = vmin.f32 %v487_v1, 2.0  ;;  %v460_v36 = vadd.f32 %v459_v34, %v376_v23  ;;  %v520_v34 = vld [vmem:[%s1092_s7 + $0x30] sm:$0xff] }
 0x2c1   :  { %v502_v37 = vmul.f32 1.442695, %v494_v35  ;;  %v488_v38 = vmax.f32 %v460_v36, -20.0  ;;  %v463_v39 = vpop.f32.mrb[20].mxu0 }
 0x2c2   :  { %v465_v41 = vpop.f32.mrb[21].mxu0  ;;  %v464_v21 = vadd.f32 %v463_v39, %v1040_v47 }
 0x2c3   :  { %766 = vpow2.f32 %v502_v37  ;;  %v495_v42 = vmin.f32 %v488_v38, 2.0  ;;  %v466_v43 = vadd.f32 %v465_v41, %v376_v23 }
 0x2c5   :  { %v504_v44 = vmul.f32 1.442695, %v495_v42  ;;  %v489_v45 = vmax.f32 %v466_v43, -20.0  ;;  %v469_v46 = vpop.f32.mrb[22].mxu0 }
 0x2c6   :  { %v471_v48 = vpop.f32.mrb[23].mxu0  ;;  %v470_v27 = vadd.f32 %v469_v46, %v1040_v47 }
 0x2c7   :  { %768 = vpow2.f32 %v504_v44  ;;  %v496_v50 = vmin.f32 %v489_v45, 2.0  ;;  %v472_v51 = vadd.f32 %v471_v48, %v376_v23 }
 0x2c9   :  { %v765_v52 = vpop.eup %764  ;;  %v506_v53 = vmul.f32 1.442695, %v496_v50  ;;  %v490_v54 = vmax.f32 %v472_v51, -20.0  ;;  %v475_v55 = vpop.f32.mrb[24].mxu0 }
 0x2ca   :  { %v521_v57 = vmul.f32 %v765_v52, %v514_v49  ;;  %v477_v58 = vpop.f32.mrb[25].mxu0  ;;  %v476_v1 = vadd.f32 %v475_v55, %v1040_v47 }
 0x2cb   :  { %770 = vpow2.f32 %v506_v53  ;;  %v497_v60 = vmin.f32 %v490_v54, 2.0  ;;  %v478_v61 = vadd.f32 %v477_v58, %v376_v23 }
 0x2cc   :  { %v528_v62 = vadd.f32 %v521_v57, %v446_v56 }
 0x2cd   :  { %v767_v63 = vpop.eup %766  ;;  %v508_v0 = vmul.f32 1.442695, %v497_v60  ;;  %v491_v2 = vmax.f32 %v478_v61, -20.0  ;;  %v481_v3 = vpop.f32.mrb[26].mxu0 }
 0x2ce   :  { %772 = vtanh.f32 %v528_v62  ;;  %v522_v5 = vmul.f32 %v767_v63, %v515_v59  ;;  %v483_v6 = vpop.f32.mrb[27].mxu0  ;;  %v482_v38 = vadd.f32 %v481_v3, %v1040_v47 }
 0x2cf   :  { %774 = vpow2.f32 %v508_v0  ;;  %v498_v8 = vmin.f32 %v491_v2, 2.0  ;;  %v484_v9 = vadd.f32 %v483_v6, %v376_v23  ;;  %v518_v23 = vld [vmem:[%s1092_s7 + $0x20] sm:$0xff]  ;;  %s836_s7 = scalar_lea.vmem %s555_s26, 896 }
 0x2d0   :  { %v529_v10 = vadd.f32 %v522_v5, %v452_v4  ;;  %p837_p2 = scmp.ne.s32.totalorder %s555_s26, %s836_s7  ;;  %p842_p4 = scmp.lt.s32.totalorder %s836_s7, %s836_s7 }
 0x2d1   :  { %v769_v11 = vpop.eup %768  ;;  %v510_v12 = vmul.f32 1.442695, %v498_v8  ;;  %v492_v13 = vmax.f32 %v484_v9, -20.0 }
 0x2d2   :  { %776 = vtanh.f32 %v529_v10  ;;  %v523_v15 = vmul.f32 %v769_v11, %v516_v7  ;;  %p843_p5 = por %p842_p4, %p841_p3 }
 0x2d3   :  { %778 = vpow2.f32 %v510_v12  ;;  %v499_v17 = vmin.f32 %v492_v13, 2.0 }
 0x2d4   :  { %v530_v18 = vadd.f32 %v523_v15, %v458_v14  ;;  %p844_p6 = pnand %p843_p5, %p837_p2 }
 0x2d5   :  { %v771_v19 = vpop.eup %770  ;;  %v512_v20 = vmul.f32 1.442695, %v499_v17 }
 0x2d6   :  { %780 = vtanh.f32 %v530_v18  ;;  %v524_v22 = vmul.f32 %v771_v19, %v517_v16 }
 0x2d7   :  { %782 = vpow2.f32 %v512_v20 }
 0x2d8   :  { %v773_v24 = vpop.eup %772  ;;  %v531_v25 = vadd.f32 %v524_v22, %v464_v21 }
 0x2d9   :  { %v775_v26 = vpop.eup %774  ;;  %542 = vst [vmem:[#allocation7] sm:$0xff] %v773_v24 }
 0x2da   :  { %784 = vtanh.f32 %v531_v25  ;;  %v525_v28 = vmul.f32 %v775_v26, %v518_v23 }
 0x2dc   :  { %v777_v30 = vpop.eup %776  ;;  %v532_v31 = vadd.f32 %v525_v28, %v470_v27 }
 0x2dd   :  { %v779_v32 = vpop.eup %778  ;;  %543 = vst [vmem:[#allocation7 + $0x8] sm:$0xff] %v777_v30 }
 0x2de   :  { %786 = vtanh.f32 %v532_v31  ;;  %v526_v33 = vmul.f32 %v779_v32, %v519_v29 }
 0x2e0   :  { %v781_v35 = vpop.eup %780  ;;  %v533_v36 = vadd.f32 %v526_v33, %v476_v1 }
 0x2e1   :  { %v783_v37 = vpop.eup %782  ;;  %544 = vst [vmem:[#allocation7 + $0x10] sm:$0xff] %v781_v35 }
 0x2e2   :  { %788 = vtanh.f32 %v533_v36  ;;  %v527_v39 = vmul.f32 %v783_v37, %v520_v34 }
 0x2e4   :  { %v785_v40 = vpop.eup %784  ;;  %v534_v41 = vadd.f32 %v527_v39, %v482_v38 }
 0x2e5   :  { %545 = vst [vmem:[#allocation7 + $0x18] sm:$0xff] %v785_v40 }
 0x2e6   :  { %790 = vtanh.f32 %v534_v41 }
 0x2e8   :  { %v787_v42 = vpop.eup %786 }
 0x2e9   :  { %546 = vst [vmem:[#allocation7 + $0x20] sm:$0xff] %v787_v42 }
 0x2ec   :  { %v789_v43 = vpop.eup %788 }
 0x2ed   :  { %547 = vst [vmem:[#allocation7 + $0x28] sm:$0xff] %v789_v43 }
 0x2f0   :  { %v791_v44 = vpop.eup %790 }
 0x2f1   :  { %548 = vst [vmem:[#allocation7 + $0x30] sm:$0xff] %v791_v44 }
 0x2f2   :  { %847 = shalt.err (!%p844_p6)
}
 0x2f3   :  { %s848_s3 = scalar_lea.hbm %s1093_s8, 896 }
 0x2f4   :  { %p849_p7 = scmp.ne.s32.totalorder %s1093_s8, %s848_s3  ;;  %p852_p8 = scmp.lt.u32.totalorder %s848_s3, %s1093_s8 }
 0x2f6   :  { %p854_p9 = pnand %p852_p8, %p849_p7 }
 0x2f8   :  { %857 = shalt.err (!%p854_p9)
}
 0x2f9   :  { %560 = dma.vmem_to_hbm [thread:$0]  %s555_s26, 896, %s1093_s8, [#allocation4], %s865_s15, %s865_s15, %s866_s16  }
 0x2fa   :  { %862 = dma.done.wait [#allocation4], 896  }
 0x2fb   :  { %863 = vsyncadd [#allocation4], 4294966400 }
 0x2fc   :  { %564 = vsyncpa [#allocation3], 1 }
 0x2fd   :  { %565 = vsyncpa [#allocation6], 1 }
 0x2fe   :  { %566 = vsyncpa [#allocation4], 1 }

</bundles_post_ra>
